<compile_context>
chip_gen: v6e
topology: v6e:2x2x1
jax: 0.10.0
libtpu: 0.0.40
codegen_flags: <defaults>
</compile_context>

<pallas_src>
import math
from functools import partial

import jax
import jax.numpy as jnp
from jax.experimental import pallas as pl
from jax.experimental.pallas import tpu as pltpu


def _round_up(x, m):
    return ((x + m - 1) // m) * m


def _query_vmem_capacity():
    # Trace-time hardware query; conservative fallback (v7x per-TC VMEM).
    try:
        return int(getattr(pltpu.get_tpu_info(), "vmem_capacity_bytes",
                           64 * 1024 * 1024))
    except Exception:
        return 64 * 1024 * 1024


_VMEM_CAP = _query_vmem_capacity()


def _linear_kernel(x_ref, w_ref, b_ref, y_ref, *, precision):
    # x_ref: (bm, bk) compute dtype, w_ref: (bk, bn) compute dtype,
    # b_ref: (1, bn) f32, y_ref: (bm, bn) f32 (resident across the K axis).
    k = pl.program_id(2)

    @pl.when(k == 0)
    def _init():
        y_ref[...] = jnp.zeros_like(y_ref)

    # Accumulate directly into the f32 output tile: no VMEM scratch needed.
    y_ref[...] += jnp.dot(
        x_ref[...], w_ref[...],
        preferred_element_type=jnp.float32,
        precision=precision,
    )

    @pl.when(k == pl.num_programs(2) - 1)
    def _finalize():
        y_ref[...] += b_ref[...]  # bias added once, in the finalize branch


@partial(jax.jit, static_argnames=("n_out", "block_m", "bn", "bk", "use_f32"))
def _linear_forward(x, w_p, b_p, *, n_out, block_m, bn, bk, use_f32):
    """x: [M, K] f32; w_p: [Kp, Np] (pre-cast, pre-padded); b_p: [1, Np] f32."""
    M, K = x.shape
    Kp, Np = w_p.shape

    compute_dtype = jnp.float32 if use_f32 else jnp.bfloat16
    precision = jax.lax.Precision.HIGHEST if use_f32 else None
    ebytes = jnp.dtype(compute_dtype).itemsize

    # M tile: sublane aligned, clamped to the problem size.
    bm = min(_round_up(max(int(block_m), 1), 8), _round_up(M, 8))
    Mp = _round_up(M, bm)

    # v7x has 2 TensorCores: make sure the parallel grid axes have >= 2 blocks.
    while (Mp // bm) * (Np // bn) < 2 and bm > 8:
        bm = _round_up(bm // 2, 8)
        Mp = _round_up(M, bm)

    # Per-call activation prep: cast + zero-pad (fuses into one pass under jit).
    x_p = x.astype(compute_dtype)
    if (Mp, Kp) != (M, K):
        x_p = jnp.pad(x_p, ((0, Mp - M), (0, Kp - K)))

    grid = (Mp // bm, Np // bn, Kp // bk)

    # VMEM: double-buffered X / W / bias tiles + double-buffered f32 out tile.
    footprint = 2 * (bm * bk * ebytes + bk * bn * ebytes + bn * 4 + bm * bn * 4)
    vmem_limit = int(min(int(0.9 * _VMEM_CAP),
                         max(2 * footprint, 32 * 1024 * 1024)))

    y_p = pl.pallas_call(
        partial(_linear_kernel, precision=precision),
        out_shape=jax.ShapeDtypeStruct((Mp, Np), jnp.float32),
        grid_spec=pltpu.PrefetchScalarGridSpec(
            num_scalar_prefetch=0,
            grid=grid,
            in_specs=[
                pl.BlockSpec((bm, bk), lambda i, j, k: (i, k)),  # X tile
                pl.BlockSpec((bk, bn), lambda i, j, k: (k, j)),  # W tile
                pl.BlockSpec((1, bn), lambda i, j, k: (0, j)),   # bias tile
            ],
            out_specs=pl.BlockSpec((bm, bn), lambda i, j, k: (i, j)),
        ),
        compiler_params=pltpu.CompilerParams(
            dimension_semantics=("parallel", "parallel", "arbitrary"),
            vmem_limit_bytes=vmem_limit,
        ),
        cost_estimate=pl.CostEstimate(
            flops=2 * Mp * Np * Kp,
            bytes_accessed=(Np // bn) * Mp * Kp * ebytes      # X re-streamed
                           + (Mp // bm) * Kp * Np * ebytes    # W re-streamed
                           + (Mp // bm) * Np * 4              # bias re-streamed
                           + Mp * Np * 4,                     # Y written
            transcendentals=0,
        ),
    )(x_p, w_p, b_p)

    if (Mp, Np) != (M, n_out):
        y_p = y_p[:M, :n_out]
    return y_p


class PallasLinear:
    """Y = X @ W + B.  Weight/bias are cast + padded ONCE at construction
    (hoisted out of the per-call path); the forward only pads the activation."""

    def __init__(self, weight, bias, *, block_m=512, block_n=1024, block_k=1024,
                 compute_dtype=jnp.bfloat16):
        K, N = weight.shape
        assert bias.shape == (N,), "bias shape mismatch"
        self.use_f32 = jnp.dtype(compute_dtype) == jnp.dtype(jnp.float32)
        ebytes = jnp.dtype(compute_dtype).itemsize

        # Align user-supplied tile sizes (the (8, 128) block constraint) and
        # clamp them to the (rounded-up) problem dims.
        bm = _round_up(max(int(block_m), 1), 8)
        bn = min(_round_up(max(int(block_n), 1), 128), _round_up(N, 128))
        bk = min(_round_up(max(int(block_k), 1), 128), _round_up(K, 128))

        # VMEM-aware shrink: keep the pipelined working set under ~70% of this
        # chip's VMEM (matters when big default tiles meet v7x's 64 MiB).
        def fp(bm_, bn_, bk_):
            return 2 * (bm_ * bk_ * ebytes + bk_ * bn_ * ebytes
                        + bn_ * 4 + bm_ * bn_ * 4)

        budget = int(0.7 * _VMEM_CAP)
        while fp(bm, bn, bk) > budget and bk > 128:
            bk = max(128, _round_up(bk // 2, 128))
        while fp(bm, bn, bk) > budget and bn > 128:
            bn = max(128, _round_up(bn // 2, 128))
        while fp(bm, bn, bk) > budget and bm > 8:
            bm = max(8, _round_up(bm // 2, 8))

        Kp, Np = _round_up(K, bk), _round_up(N, bn)

        # One-time weight/bias prep: cast to the MXU streaming dtype and
        # zero-pad K (reduction dim must be zeros) / N (lane-dense output).
        w_p = weight.astype(compute_dtype)
        if (Kp, Np) != (K, N):
            w_p = jnp.pad(w_p, ((0, Kp - K), (0, Np - N)))
        b_p = bias.astype(jnp.float32).reshape(1, N)
        if Np != N:
            b_p = jnp.pad(b_p, ((0, 0), (0, Np - N)))

        self.w_p = w_p
        self.b_p = b_p
        self.n_out = N
        self.block_m = bm
        self.bn = bn
        self.bk = bk

    def __call__(self, x):
        return _linear_forward(
            x, self.w_p, self.b_p,
            n_out=self.n_out, block_m=self.block_m,
            bn=self.bn, bk=self.bk, use_f32=self.use_f32,
        )


def triton_linear_forward(x, weight, bias, **kwargs):
    """Functional convenience wrapper (prep is re-done each call; prefer
    constructing PallasLinear once if the layer is reused)."""
    return PallasLinear(weight, bias, **kwargs)(x)


def init_params(key, in_features, out_features):
    """Deterministic init mirroring TritonLinear.reset_parameters().

    weight shape is (in_features, out_features); torch's fan_in for that
    tensor is out_features, so both bounds are 1/sqrt(out_features) with
    kaiming_uniform_(a=sqrt(5))."""
    kw, kb = jax.random.split(key)
    bound = 1.0 / math.sqrt(out_features)  # torch fan_in = tensor.size(1)
    weight = jax.random.uniform(
        kw, (in_features, out_features), jnp.float32, minval=-bound, maxval=bound)
    bias = jax.random.uniform(
        kb, (out_features,), jnp.float32, minval=-bound, maxval=bound)
    return weight, bias


if __name__ == "__main__":
    key = jax.random.PRNGKey(0)
    k_x, k_p, k_x2, k_p2 = jax.random.split(key, 4)

    # Case 1: toy shape from the original module (N = 24 is deliberately not a
    # power of two / multiple of 128).
    M, K, N = 32, 32, 24
    x = jax.random.normal(k_x, (M, K), jnp.float32)
    weight, bias = init_params(k_p, K, N)

    layer = PallasLinear(weight, bias)          # weight cast + pad hoisted here
    y = jax.block_until_ready(layer(x))

    # Reference with the same bf16 operand streaming / f32 accumulation.
    y_ref_bf16 = jnp.dot(x.astype(jnp.bfloat16), weight.astype(jnp.bfloat16),
                         preferred_element_type=jnp.float32) + bias
    y_ref_f32 = x @ weight + bias
    assert jnp.allclose(y, y_ref_bf16, atol=2e-3, rtol=2e-3), "mismatch vs bf16 ref (1)"
    assert jnp.allclose(y, y_ref_f32, atol=1e-1, rtol=5e-2), "mismatch vs f32 ref (1)"

    # Case 2: ragged M and a multi-step K reduction (small blocks force >1 K step).
    M2, K2, N2 = 50, 300, 24
    x2 = jax.random.normal(k_x2, (M2, K2), jnp.float32)
    weight2, bias2 = init_params(k_p2, K2, N2)

    layer2 = PallasLinear(weight2, bias2, block_m=64, block_n=128, block_k=128)
    y2 = jax.block_until_ready(layer2(x2))

    y2_ref_bf16 = jnp.dot(x2.astype(jnp.bfloat16), weight2.astype(jnp.bfloat16),
                          preferred_element_type=jnp.float32) + bias2
    y2_ref_f32 = x2 @ weight2 + bias2
    assert jnp.allclose(y2, y2_ref_bf16, atol=2e-3, rtol=2e-3), "mismatch vs bf16 ref (2)"
    assert jnp.allclose(y2, y2_ref_f32, atol=1e-1, rtol=5e-2), "mismatch vs f32 ref (2)"

    print("KERNEL_OK")
</pallas_src>

<mosaic_0001>
module attributes {stable_mosaic.version = 11 : i64} {
  func.func @_linear_kernel(%arg0: i32, %arg1: i32, %arg2: i32, %arg3: memref<16x128xbf16, #tpu.memory_space<vmem>>, %arg4: memref<128x128xbf16, #tpu.memory_space<vmem>>, %arg5: memref<1x128xf32, #tpu.memory_space<vmem>>, %arg6: memref<16x128xf32, #tpu.memory_space<vmem>>) attributes {dimension_semantics = [#tpu.dimension_semantics<parallel>, #tpu.dimension_semantics<parallel>, #tpu.dimension_semantics<arbitrary>], iteration_bounds = array<i64: 2, 1, 1>, scalar_prefetch = 0 : i64, scratch_operands = 0 : i64, tpu.core_type = #tpu.core_type<tc>, window_params = [{transform_indices = @transform_0, window_bounds = array<i64: 16, 128>}, {transform_indices = @transform_1, window_bounds = array<i64: 128, 128>}, {transform_indices = @transform_2, window_bounds = array<i64: 1, 128>}, {transform_indices = @transform_3, window_bounds = array<i64: 16, 128>}]} {
    %c0_i32 = arith.constant 0 : i32
    %0 = arith.cmpi eq, %arg2, %c0_i32 : i32
    %1 = arith.extui %0 : i1 to i32
    %c0_i32_0 = arith.constant 0 : i32
    %2 = arith.cmpi ne, %1, %c0_i32_0 : i32
    scf.if %2 {
      %cst_10 = arith.constant 0.000000e+00 : f32
      %12 = vector.broadcast %cst_10 : f32 to vector<16x128xf32>
      %c0_11 = arith.constant 0 : index
      %c0_12 = arith.constant 0 : index
      %13 = vector.load %arg6[%c0_11, %c0_12] : memref<16x128xf32, #tpu.memory_space<vmem>>, vector<16x128xf32>
      tpu.vector_store %arg6[%c0_11, %c0_12], %12 {strides = array<i32>} : memref<16x128xf32, #tpu.memory_space<vmem>>, vector<16x128xf32>,
    } else {
    }
    %c0 = arith.constant 0 : index
    %c0_1 = arith.constant 0 : index
    %3 = vector.load %arg6[%c0, %c0_1] : memref<16x128xf32, #tpu.memory_space<vmem>>, vector<16x128xf32>
    %c0_2 = arith.constant 0 : index
    %c0_3 = arith.constant 0 : index
    %4 = vector.load %arg3[%c0_2, %c0_3] : memref<16x128xbf16, #tpu.memory_space<vmem>>, vector<16x128xbf16>
    %c0_4 = arith.constant 0 : index
    %c0_5 = arith.constant 0 : index
    %5 = vector.load %arg4[%c0_4, %c0_5] : memref<128x128xbf16, #tpu.memory_space<vmem>>, vector<128x128xbf16>
    %cst = arith.constant dense<0.000000e+00> : vector<16x128xf32>
    %6 = tpu.matmul %4, %5, %cst {dimension_numbers = #tpu.dot_dimension_numbers<[1], [0], [0], [1], [0, 0, 1, 1], [], []>} : vector<16x128xbf16>, vector<128x128xbf16>, vector<16x128xf32> -> vector<16x128xf32>
    %7 = arith.addf %3, %6 : vector<16x128xf32>
    %c0_6 = arith.constant 0 : index
    %c0_7 = arith.constant 0 : index
    %8 = vector.load %arg6[%c0_6, %c0_7] : memref<16x128xf32, #tpu.memory_space<vmem>>, vector<16x128xf32>
    tpu.vector_store %arg6[%c0_6, %c0_7], %7 {strides = array<i32>} : memref<16x128xf32, #tpu.memory_space<vmem>>, vector<16x128xf32>,
    %c0_i32_8 = arith.constant 0 : i32
    %9 = arith.cmpi eq, %arg2, %c0_i32_8 : i32
    %10 = arith.extui %9 : i1 to i32
    %c0_i32_9 = arith.constant 0 : i32
    %11 = arith.cmpi ne, %10, %c0_i32_9 : i32
    scf.if %11 {
      %c0_10 = arith.constant 0 : index
      %c0_11 = arith.constant 0 : index
      %12 = vector.load %arg6[%c0_10, %c0_11] : memref<16x128xf32, #tpu.memory_space<vmem>>, vector<16x128xf32>
      %c0_12 = arith.constant 0 : index
      %c0_13 = arith.constant 0 : index
      %13 = vector.load %arg5[%c0_12, %c0_13] : memref<1x128xf32, #tpu.memory_space<vmem>>, vector<1x128xf32>
      %14 = vector.broadcast %13 : vector<1x128xf32> to vector<16x128xf32>
      %15 = arith.addf %12, %14 : vector<16x128xf32>
      %c0_14 = arith.constant 0 : index
      %c0_15 = arith.constant 0 : index
      %16 = vector.load %arg6[%c0_14, %c0_15] : memref<16x128xf32, #tpu.memory_space<vmem>>, vector<16x128xf32>
      tpu.vector_store %arg6[%c0_14, %c0_15], %15 {strides = array<i32>} : memref<16x128xf32, #tpu.memory_space<vmem>>, vector<16x128xf32>,
    } else {
    }
    return
  }
  func.func @transform_0(%arg0: i32, %arg1: i32, %arg2: i32) -> (i32, i32) {
    %c0_i32 = arith.constant 0 : i32
    return %arg0, %arg2 : i32, i32
  }
  func.func @transform_1(%arg0: i32, %arg1: i32, %arg2: i32) -> (i32, i32) {
    %c0_i32 = arith.constant 0 : i32
    return %arg2, %arg1 : i32, i32
  }
  func.func @transform_2(%arg0: i32, %arg1: i32, %arg2: i32) -> (i32, i32) {
    %c0_i32 = arith.constant 0 : i32
    %c0_i32_0 = arith.constant 0 : i32
    return %c0_i32, %arg1 : i32, i32
  }
  func.func @transform_3(%arg0: i32, %arg1: i32, %arg2: i32) -> (i32, i32) {
    %c0_i32 = arith.constant 0 : i32
    return %arg0, %arg1 : i32, i32
  }
}

</mosaic_0001>

<bundles_post_ra>
// kernel: _linear_forward.1
= control target key start
LH: loop header
LB: loop body
LE: loop exit
PB: predicated region body
PF: predicated region fallthrough
CT: control target
= control target key end

     0   :  { %s645_s12 = smov 0   ;;  %s647_s13 = smov 0   ;;  %s715_s0 = inlined_call_operand.vmem [shape: bf16[32,128], index: 0, kind: input, shape index: {}]   ;;  %s716_s1 = inlined_call_operand.vmem [shape: bf16[128,128], index: 1, kind: input, shape index: {}]   ;;  %s717_s2 = inlined_call_operand.vmem [shape: f32[1,128], index: 2, kind: input, shape index: {}]   ;;  %s718_s3 = inlined_call_operand.vmem [shape: f32[32,128], index: 3, kind: output, shape index: {}]  }
   0x1   :  { %s649_s14 = smov 0  }
   0x2 LB: > { %s32_s15 = sadd.s32 1, %s617_s13  ;;  %p518_p0 = scmp.ge.s32.totalorder %s621_s14, 1  ;;  %s621_s14 = sphi %s649_s14, %s13_s14   ;;  %s617_s13 = sphi %s647_s13, %s720_s13   ;;  %s613_s12 = sphi %s645_s12, %s719_s12  }
   0x3   : > { %p34_p1 = scmp.ge.s32.totalorder %s32_s15, 2  ;;  %p188_p2 = scmp.lt.s32.totalorder %s621_s14, 3 }
   0x5   : > { %s722_s15 = smov (%p34_p1, %s32_s15), 0  ;;  %p189_p3 = pnand %p518_p0, %p188_p2 }
   0x6   : > { %s519_s20 = sshll.u32 (!%p189_p3), %s613_s12, 1 }
   0x7   : > { %192 = sbr.rel (%p189_p3) target bundleno = 251 (0xfb), region = 32  ;;  %p230_p4 = scmp.lt.s32.totalorder (!%p189_p3), %s519_s20, 3 }
   0xc   : > { %v590_v0 = vld [vmem:[%s716_s1 + $0x38] sm:$0xff]   ;;  %v623_v1 = vmov 0.0   ;;  %v591_v2 = vld [vmem:[%s716_s1 + $0x30] sm:$0xff]   ;;  %vm624_vm0 = vmmov 0   ;;  %s724_s20 = smov (!%p230_p4, %s519_s20), 3  ;;  %v592_v3 = vld [vmem:[%s716_s1 + $0x28] sm:$0xff]  }
   0xd   : > { %544 = vmatprep.subr.bf16.mxu0 %v623_v1  ;;  %560 = vmatprep.mubr.msk.bf16.mxu0 %vm624_vm0, %v623_v1  ;;  %s520_s23 = sshll.u32 %s724_s20, 2  ;;  %s522_s27 = sshll.u32 %s724_s20, 3  ;;  %v593_v4 = vld [vmem:[%s716_s1 + $0x20] sm:$0xff]   ;;  %v594_v5 = vld [vmem:[%s716_s1 + $0x18] sm:$0xff]   ;;  %v595_v6 = vld [vmem:[%s716_s1 + $0x10] sm:$0xff]  }
   0xe   : > { %545 = vmatpush3.bf16.msra.mxu0 %v590_v0  ;;  %s236_s26 = scalar_lea.vmem %s715_s0, %s520_s23  ;;  %s678_s30 = scalar_lea.vmem %s718_s3, %s522_s27  ;;  %v596_v7 = vld [vmem:[%s716_s1 + $0x8] sm:$0xff]   ;;  %v597_v8 = vld [vmem:[%s716_s1] sm:$0xff]  }
   0xf   : > { %546 = vmatprep.subr.bf16.mxu0 %v623_v1  ;;  %264 = vst [vmem:[%s678_s30] sm:$0xff] %v623_v1  ;;  %265 = vst [vmem:[%s678_s30 + $0x8] sm:$0xff] %v623_v1  ;;  %v598_v9 = vld [vmem:[%s236_s26] sm:$0xff]  }
  0x10   : > { %v532_v16 = vld [vmem:[%s717_s2] ss:$0 sm:$0xff] }
  0x12   : > { %547 = vmatpush3.bf16.msra.mxu0 %v591_v2 }
  0x13   : > { %548 = vmatprep.subr.bf16.mxu0 %v623_v1 }
  0x16   : > { %549 = vmatpush3.bf16.msra.mxu0 %v592_v3  ;;  %v266_v10 = vld [vmem:[%s678_s30] sm:$0xff] }
  0x17   : > { %550 = vmatprep.subr.bf16.mxu0 %v623_v1 }
  0x1a   : > { %551 = vmatpush3.bf16.msra.mxu0 %v593_v4 }
  0x1b   : > { %552 = vmatprep.subr.bf16.mxu0 %v623_v1 }
  0x1e   : > { %553 = vmatpush3.bf16.msra.mxu0 %v594_v5 }
  0x1f   : > { %554 = vmatprep.subr.bf16.mxu0 %v623_v1 }
  0x22   : > { %555 = vmatpush3.bf16.msra.mxu0 %v595_v6 }
  0x23   : > { %556 = vmatprep.subr.bf16.mxu0 %v623_v1 }
  0x26   : > { %557 = vmatpush3.bf16.msra.mxu0 %v596_v7 }
  0x27   : > { %558 = vmatprep.subr.bf16.mxu0 %v623_v1 }
  0x2a   : > { %559 = vmatpush3.bf16.msra.mxu0 %v597_v8 }
  0x2d   : > { %561 = vmatmul.mubr.bf16.vlgmr.msra.gmra.mxu0 %v598_v9 }
  0xed   : > { %v374_v11 = vpop.f32.mrf.mxu0 }
  0xee   : > { %v381_v12 = vadd.f32 %v374_v11, %v266_v10 }
  0xef   : > { %v562_v13 = vpop.f32.mrf.mxu0 }
  0xf0   : > { %383 = vst [vmem:[%s678_s30] sm:$0xff] %v381_v12 }
  0xf1   : > { %v377_v14 = vpop.f32.mrf.mxu0 }
  0xf2   : > { %384 = vst [vmem:[%s678_s30 + $0x8] sm:$0xff] %v377_v14  ;;  %v398_v19 = vadd.f32 %v532_v16, %v377_v14 }
  0xf3   : > { %v563_v15 = vpop.f32.mrf.mxu0 }
  0xf4   : > { %400 = vst [vmem:[%s678_s30 + $0x8] sm:$0xff] %v398_v19 }
  0xf7   : > { %v388_v17 = vld [vmem:[%s678_s30] sm:$0xff] }
  0xf8   : > { %v397_v18 = vadd.f32 %v532_v16, %v388_v17 }
  0xfa   : > { %399 = vst [vmem:[%s678_s30] sm:$0xff] %v397_v18 }
  0xfb PF: > { %s13_s14 = sadd.s32 1, %s621_s14   ;;  %s719_s12 = smov %s617_s13 }
  0xfc   : > { %p10_p5 = scmp.ge.s32.totalorder %s13_s14, 4   ;;  %s720_s13 = smov %s722_s15 }
  0xfe   :  { %12 = sbr.rel (!%p10_p5) target bundleno = 2 (0x2), region = 76 }

</bundles_post_ra>
